<compile_context>
chip_gen: v5e
topology: v5e:2x2
jax: 0.10.0
libtpu: 0.0.40
codegen_flags: <defaults>
</compile_context>

<pallas_src>
import math
import functools
import numpy as np
import jax
import jax.numpy as jnp
from jax.experimental import pallas as pl
from jax.experimental.pallas import tpu as pltpu

LATENT_DIM = 32
HIDDEN = 32        # 32 * 1 * 1 * 1
C_MID = 16
SP_MID = 3         # 1x1x1 upsampled by 3
SP_OUT = 5         # 3x3x3 upsampled by 5/3 -> floor(3 * 5/3) = 5
N_VOX = SP_OUT ** 3            # 125
N_PAD = 128                    # lane-dense padded output width
SMALL_B = 512                  # below this, pure-XLA fallback (unless forced)


def linear_interp_matrix(in_size, out_size):
    """PyTorch Upsample(mode='*linear', align_corners=False) along one axis, as (out,in) matrix."""
    m = np.zeros((out_size, in_size), dtype=np.float64)
    scale = in_size / out_size
    for d in range(out_size):
        src = (d + 0.5) * scale - 0.5
        src = max(src, 0.0)                       # PyTorch clamps negative source index to 0
        i0 = min(int(math.floor(src)), in_size - 1)
        i1 = min(i0 + 1, in_size - 1)
        frac = src - i0
        m[d, i0] += 1.0 - frac
        m[d, i1] += frac
    return m


# --------------------------------------------------------------------------- kernel

def decoder_kernel(x_ref, w1_ref, b1_ref, wf_ref, bf_ref, o_ref):
    # linear_up + ReLU (bias/ReLU kept in f32 regardless of operand dtype -> v5e-safe)
    h = jnp.maximum(
        jnp.dot(x_ref[...], w1_ref[...], preferred_element_type=jnp.float32)
        + b1_ref[...],
        0.0)
    # Fused tail: Conv3d(32,16,1) -> 1->3 trilinear -> Conv3d(16,1,1) -> 3->5 trilinear,
    # all collapsed host-side into a single (32, 128) matmul + (1, 128) bias.
    o_ref[...] = (
        jnp.dot(h.astype(wf_ref.dtype), wf_ref[...],
                preferred_element_type=jnp.float32)
        + bf_ref[...]
    ).astype(o_ref.dtype)


# --------------------------------------------------------------------------- host-side param fusion

def _fuse_tail(w2, b2, w3, b3):
    """Collapse conv2 -> up(3) -> conv1 -> up(5/3) into one (32,128) matrix + (1,128) bias (f64 host math)."""
    u13 = linear_interp_matrix(1, SP_MID)                       # (3,1), all ones (replication)
    rep = np.kron(np.kron(u13, u13), u13).T                     # (1, 27)
    u35 = linear_interp_matrix(SP_MID, SP_OUT)                  # (5, 3)
    k35 = np.kron(np.kron(u35, u35), u35).T                     # (27, 125)
    tail = rep @ k35                                            # (1, 125)

    w2_ = np.asarray(w2, np.float64)                            # (16, 32)
    w3_ = np.asarray(w3, np.float64)                            # (1, 16)
    b2_ = np.asarray(b2, np.float64).reshape(1, C_MID)
    b3_ = np.asarray(b3, np.float64).reshape(1, 1)

    w_f = w2_.T @ w3_.T @ tail                                  # (32, 125)
    b_f = (b2_ @ w3_.T + b3_) @ tail                            # (1, 125)

    w_pad = np.zeros((HIDDEN, N_PAD), np.float32); w_pad[:, :N_VOX] = w_f
    b_pad = np.zeros((1, N_PAD), np.float32);      b_pad[:, :N_VOX] = b_f
    return w_pad, b_pad


def prepare_params(torch_params, *, compute_dtype=jnp.float32):
    """One-time host-side fusion of PyTorch-layout params into kernel-ready arrays.
    bf16 compute_dtype is fine on v5e/v6e/v7x (MXU bf16 operands, f32 accumulation)."""
    w1, b1, w2, b2, w3, b3 = torch_params
    wf_np, bf_np = _fuse_tail(w2, b2, w3, b3)
    # NOTE: quantizing the already-fused (32,128) tail to bf16 in one shot is very
    # slightly different from per-layer bf16; acceptable at the documented tolerance.
    return dict(
        w1=jnp.asarray(np.asarray(w1).T, dtype=compute_dtype),              # (L, 32)
        b1=jnp.asarray(np.asarray(b1).reshape(1, HIDDEN), jnp.float32),     # (1, 32)
        wf=jnp.asarray(wf_np, dtype=compute_dtype),                         # (32, 128)
        bf=jnp.asarray(bf_np, dtype=jnp.float32),                           # (1, 128)
    )


def make_params(latent_dim, key):
    ks = jax.random.split(key, 6)
    w1 = 0.1 * jax.random.normal(ks[0], (HIDDEN, latent_dim), jnp.float32)   # Linear(latent, 32)
    b1 = 0.1 * jax.random.normal(ks[1], (HIDDEN,), jnp.float32)
    w2 = 0.1 * jax.random.normal(ks[2], (C_MID, HIDDEN), jnp.float32)        # Conv3d(32,16,1)
    b2 = 0.1 * jax.random.normal(ks[3], (C_MID,), jnp.float32)
    w3 = 0.1 * jax.random.normal(ks[4], (1, C_MID), jnp.float32)             # Conv3d(16,1,1)
    b3 = 0.1 * jax.random.normal(ks[5], (1,), jnp.float32)
    return w1, b1, w2, b2, w3, b3


# --------------------------------------------------------------------------- wrapper

def _choose_tb(B, block_b, align):
    """Batch tile: multiple of `align`, <= block_b, >= ~8 grid steps when possible
    (>=4 blocks per v7x TensorCore for double-buffer overlap), minimal pad waste."""
    n_steps = max(8, -(-B // block_b))          # ceil(B/block_b), at least 8
    tb = -(-B // n_steps)                       # ceil(B/n_steps)
    tb = align * (-(-tb // align))              # round up to alignment
    return max(align, min(block_b, tb))


def _xla_small_batch(x, p, out_dtype):
    h = jnp.maximum(
        jnp.dot(x.astype(p['w1'].dtype), p['w1'],
                preferred_element_type=jnp.float32) + p['b1'], 0.0)
    return (jnp.dot(h.astype(p['wf'].dtype), p['wf'],
                    preferred_element_type=jnp.float32) + p['bf']).astype(out_dtype)


def decoder_forward(x, params, *, block_b=4096, out_dtype=jnp.float32,
                    crop=True, force_pallas=False):
    """x: (B, latent_dim) -> (B, 1, 5, 5, 5) NCDHW (crop=True), else raw (b_pad, 128) slab.

    `params` comes from prepare_params().  Run this under the same jit as the
    consumer (or use crop=False) so the final slice/reshape fuses instead of
    re-streaming the output through HBM.
    """
    B, L = x.shape
    compute_dtype = params['w1'].dtype

    if B < SMALL_B and not force_pallas:
        out_flat = _xla_small_batch(x, params, out_dtype)
    else:
        # bf16 blocks want a sublane-pair-aligned second-minor dim.
        align = 16 if (compute_dtype == jnp.bfloat16 or
                       jnp.dtype(out_dtype) == jnp.bfloat16) else 8
        tb = _choose_tb(B, block_b, align)
        b_pad = tb * (-(-B // tb))               # <= one tile of padding, never a full block_b
        x_c = x.astype(compute_dtype)
        if b_pad != B:
            x_c = jnp.pad(x_c, ((0, b_pad - B), (0, 0)))

        bytes_accessed = (b_pad * L * jnp.dtype(compute_dtype).itemsize
                          + b_pad * N_PAD * jnp.dtype(out_dtype).itemsize
                          + (L * HIDDEN + HIDDEN * N_PAD + HIDDEN + N_PAD) * 4)
        cost = pl.CostEstimate(
            flops=2 * b_pad * (L * HIDDEN + HIDDEN * N_PAD),
            transcendentals=0,
            bytes_accessed=bytes_accessed)

        full = lambda a: pl.BlockSpec(a.shape, lambda i: (0, 0))   # VMEM-resident weights
        out_flat = pl.pallas_call(
            decoder_kernel,
            out_shape=jax.ShapeDtypeStruct((b_pad, N_PAD), out_dtype),
            grid=(b_pad // tb,),
            in_specs=[
                pl.BlockSpec((tb, L), lambda i: (i, 0)),
                full(params['w1']), full(params['b1']),
                full(params['wf']), full(params['bf']),
            ],
            out_specs=pl.BlockSpec((tb, N_PAD), lambda i: (i, 0)),
            compiler_params=pltpu.CompilerParams(
                dimension_semantics=("parallel",)),
            cost_estimate=cost,
        )(x_c, params['w1'], params['b1'], params['wf'], params['bf'])

    if not crop:
        return out_flat
    return out_flat[:B, :N_VOX].reshape(B, 1, SP_OUT, SP_OUT, SP_OUT)


# --------------------------------------------------------------------------- pure-JAX reference

def reference_forward(x, torch_params):
    """Pure-JAX reference following the PyTorch forward literally (no collapsing)."""
    w1, b1, w2, b2, w3, b3 = torch_params
    h = jax.nn.relu(x @ w1.T + b1)
    v = h.reshape(-1, HIDDEN, 1, 1, 1)
    c2 = jnp.einsum('bidhw,oi->bodhw', v, w2) + b2[None, :, None, None, None]
    u13 = jnp.asarray(linear_interp_matrix(1, SP_MID).astype(np.float32))
    c2u = jnp.einsum('bcdhw,Dd,Hh,Ww->bcDHW', c2, u13, u13, u13)
    c1 = jnp.einsum('bidhw,oi->bodhw', c2u, w3) + b3[None, :, None, None, None]
    u35 = jnp.asarray(linear_interp_matrix(SP_MID, SP_OUT).astype(np.float32))
    return jnp.einsum('bcdhw,Dd,Hh,Ww->bcDHW', c1, u35, u35, u35)


# --------------------------------------------------------------------------- tests

if __name__ == "__main__":
    key = jax.random.PRNGKey(0)
    k_x, k_p, k_x2 = jax.random.split(key, 3)
    raw_params = make_params(LATENT_DIM, k_p)
    params_f32 = prepare_params(raw_params, compute_dtype=jnp.float32)

    # 1) Small batch, forced through the Pallas kernel (f32, strict tolerance).
    B = 8
    x = jax.random.normal(k_x, (B, LATENT_DIM), jnp.float32)
    fwd_small = jax.jit(functools.partial(decoder_forward, force_pallas=True))
    out = jax.block_until_ready(fwd_small(x, params_f32))
    ref = np.asarray(reference_forward(x, raw_params))
    assert out.shape == (B, 1, SP_OUT, SP_OUT, SP_OUT), out.shape
    np.testing.assert_allclose(np.asarray(out), ref, rtol=1e-5, atol=1e-5)

    # 1b) Small-batch pure-XLA fallback path.
    out_fb = jax.block_until_ready(jax.jit(decoder_forward)(x, params_f32))
    np.testing.assert_allclose(np.asarray(out_fb), ref, rtol=1e-5, atol=1e-5)

    # 2) Larger batch: >=8 grid steps, from-B tile sizing, ragged tail padding.
    B2 = 2000
    x2 = jax.random.normal(k_x2, (B2, LATENT_DIM), jnp.float32)
    fwd = jax.jit(decoder_forward)            # crop fuses inside the same jit
    out2 = jax.block_until_ready(fwd(x2, params_f32))
    ref2 = np.asarray(reference_forward(x2, raw_params))
    np.testing.assert_allclose(np.asarray(out2), ref2, rtol=1e-5, atol=1e-5)

    # 3) bf16 operands (f32 accumulation) -- valid on v5e/v6e/v7x.
    params_bf16 = prepare_params(raw_params, compute_dtype=jnp.bfloat16)
    out_bf = jax.block_until_ready(fwd(x2, params_bf16))
    np.testing.assert_allclose(np.asarray(out_bf), ref2, rtol=5e-2, atol=5e-2)

    # 4) Optional bf16 output store (halves the dominant HBM write stream).
    fwd_bf16out = jax.jit(functools.partial(decoder_forward, out_dtype=jnp.bfloat16))
    out_bo = jax.block_until_ready(fwd_bf16out(x2, params_f32))
    np.testing.assert_allclose(np.asarray(out_bo, dtype=np.float32), ref2,
                               rtol=5e-2, atol=5e-2)

    # 5) Uncropped padded-slab contract (for downstream fusion).
    slab = jax.block_until_ready(
        jax.jit(functools.partial(decoder_forward, crop=False))(x2, params_f32))
    assert slab.shape[1] == N_PAD and slab.shape[0] >= B2
    np.testing.assert_allclose(
        np.asarray(slab[:B2, :N_VOX]).reshape(B2, 1, SP_OUT, SP_OUT, SP_OUT),
        ref2, rtol=1e-5, atol=1e-5)

    print("KERNEL_OK")
</pallas_src>

<mosaic_0001>
module attributes {stable_mosaic.version = 11 : i64} {
  func.func @decoder_kernel(%arg0: i32, %arg1: memref<8x32xf32, #tpu.memory_space<vmem>>, %arg2: memref<32x32xf32, #tpu.memory_space<vmem>>, %arg3: memref<1x32xf32, #tpu.memory_space<vmem>>, %arg4: memref<32x128xf32, #tpu.memory_space<vmem>>, %arg5: memref<1x128xf32, #tpu.memory_space<vmem>>, %arg6: memref<8x128xf32, #tpu.memory_space<vmem>>) attributes {dimension_semantics = [#tpu.dimension_semantics<parallel>], iteration_bounds = array<i64: 1>, scalar_prefetch = 0 : i64, scratch_operands = 0 : i64, tpu.core_type = #tpu.core_type<tc>, window_params = [{transform_indices = @transform_0, window_bounds = array<i64: 8, 32>}, {pipeline_mode = #tpu.pipeline_mode<synchronous>, transform_indices = @transform_1, window_bounds = array<i64: 32, 32>}, {pipeline_mode = #tpu.pipeline_mode<synchronous>, transform_indices = @transform_2, window_bounds = array<i64: 1, 32>}, {pipeline_mode = #tpu.pipeline_mode<synchronous>, transform_indices = @transform_3, window_bounds = array<i64: 32, 128>}, {pipeline_mode = #tpu.pipeline_mode<synchronous>, transform_indices = @transform_4, window_bounds = array<i64: 1, 128>}, {transform_indices = @transform_5, window_bounds = array<i64: 8, 128>}]} {
    %c0 = arith.constant 0 : index
    %c0_0 = arith.constant 0 : index
    %0 = vector.load %arg1[%c0, %c0_0] : memref<8x32xf32, #tpu.memory_space<vmem>>, vector<8x32xf32>
    %c0_1 = arith.constant 0 : index
    %c0_2 = arith.constant 0 : index
    %1 = vector.load %arg2[%c0_1, %c0_2] : memref<32x32xf32, #tpu.memory_space<vmem>>, vector<32x32xf32>
    %cst = arith.constant dense<0.000000e+00> : vector<8x32xf32>
    %2 = tpu.matmul %0, %1, %cst {dimension_numbers = #tpu.dot_dimension_numbers<[1], [0], [0], [1], [0, 0, 1, 1], [], []>} : vector<8x32xf32>, vector<32x32xf32>, vector<8x32xf32> -> vector<8x32xf32>
    %c0_3 = arith.constant 0 : index
    %c0_4 = arith.constant 0 : index
    %3 = vector.load %arg3[%c0_3, %c0_4] : memref<1x32xf32, #tpu.memory_space<vmem>>, vector<1x32xf32>
    %4 = vector.broadcast %3 : vector<1x32xf32> to vector<8x32xf32>
    %5 = arith.addf %2, %4 : vector<8x32xf32>
    %cst_5 = arith.constant 0.000000e+00 : f32
    %6 = vector.broadcast %cst_5 : f32 to vector<8x32xf32>
    %7 = arith.maximumf %5, %6 : vector<8x32xf32>
    %c0_6 = arith.constant 0 : index
    %c0_7 = arith.constant 0 : index
    %8 = vector.load %arg4[%c0_6, %c0_7] : memref<32x128xf32, #tpu.memory_space<vmem>>, vector<32x128xf32>
    %cst_8 = arith.constant dense<0.000000e+00> : vector<8x128xf32>
    %9 = tpu.matmul %7, %8, %cst_8 {dimension_numbers = #tpu.dot_dimension_numbers<[1], [0], [0], [1], [0, 0, 1, 1], [], []>} : vector<8x32xf32>, vector<32x128xf32>, vector<8x128xf32> -> vector<8x128xf32>
    %c0_9 = arith.constant 0 : index
    %c0_10 = arith.constant 0 : index
    %10 = vector.load %arg5[%c0_9, %c0_10] : memref<1x128xf32, #tpu.memory_space<vmem>>, vector<1x128xf32>
    %11 = vector.broadcast %10 : vector<1x128xf32> to vector<8x128xf32>
    %12 = arith.addf %9, %11 : vector<8x128xf32>
    %c0_11 = arith.constant 0 : index
    %c0_12 = arith.constant 0 : index
    %13 = vector.load %arg6[%c0_11, %c0_12] : memref<8x128xf32, #tpu.memory_space<vmem>>, vector<8x128xf32>
    tpu.vector_store %arg6[%c0_11, %c0_12], %12 {strides = array<i32>} : memref<8x128xf32, #tpu.memory_space<vmem>>, vector<8x128xf32>,
    return
  }
  func.func @transform_0(%arg0: i32) -> (i32, i32) {
    %c0_i32 = arith.constant 0 : i32
    %c0_i32_0 = arith.constant 0 : i32
    return %arg0, %c0_i32 : i32, i32
  }
  func.func @transform_1(%arg0: i32) -> (i32, i32) {
    %c0_i32 = arith.constant 0 : i32
    %c0_i32_0 = arith.constant 0 : i32
    %c0_i32_1 = arith.constant 0 : i32
    return %c0_i32, %c0_i32_0 : i32, i32
  }
  func.func @transform_2(%arg0: i32) -> (i32, i32) {
    %c0_i32 = arith.constant 0 : i32
    %c0_i32_0 = arith.constant 0 : i32
    %c0_i32_1 = arith.constant 0 : i32
    return %c0_i32, %c0_i32_0 : i32, i32
  }
  func.func @transform_3(%arg0: i32) -> (i32, i32) {
    %c0_i32 = arith.constant 0 : i32
    %c0_i32_0 = arith.constant 0 : i32
    %c0_i32_1 = arith.constant 0 : i32
    return %c0_i32, %c0_i32_0 : i32, i32
  }
  func.func @transform_4(%arg0: i32) -> (i32, i32) {
    %c0_i32 = arith.constant 0 : i32
    %c0_i32_0 = arith.constant 0 : i32
    %c0_i32_1 = arith.constant 0 : i32
    return %c0_i32, %c0_i32_0 : i32, i32
  }
  func.func @transform_5(%arg0: i32) -> (i32, i32) {
    %c0_i32 = arith.constant 0 : i32
    %c0_i32_0 = arith.constant 0 : i32
    return %arg0, %c0_i32 : i32, i32
  }
}

</mosaic_0001>

<bundles_post_ra>
// kernel: decoder_forward.1
= control target key start
LH: loop header
LB: loop body
LE: loop exit
PB: predicated region body
PF: predicated region fallthrough
CT: control target
= control target key end

     0   :  { %10 = vsyncpa [#allocation3], 0  ;;  %s318_s0 = inlined_call_operand.hbm [shape: f32[8,32], index: 0, kind: input, shape index: {}]   ;;  %s319_s1 = inlined_call_operand.hbm [shape: f32[32,32], index: 1, kind: input, shape index: {}]   ;;  %s320_s2 = inlined_call_operand.hbm [shape: f32[1,32], index: 2, kind: input, shape index: {}]   ;;  %s321_s3 = inlined_call_operand.hbm [shape: f32[32,128], index: 3, kind: input, shape index: {}]   ;;  %s322_s4 = inlined_call_operand.vmem [shape: f32[1,128], index: 4, kind: input, shape index: {}]   ;;  %s323_s5 = inlined_call_operand.vmem [shape: f32[8,128], index: 5, kind: output, shape index: {}]  }
   0x1   :  { %11 = vsyncpa [#allocation5], 0  ;;  %s28_s20 = sshll.u32 %s319_s1, 4  ;;  %s29_s20 = int_to_ptr.hbm [resolvable:$true] %s28_s20 }
   0x2   :  { %12 = vsyncpa [#allocation8], 0  ;;  %s264_s21 = smov [#allocation4]   ;;  %s18_s25 = sshll.u32 %s318_s0, 4  ;;  %s19_s25 = int_to_ptr.hbm [resolvable:$true] %s18_s25 }
   0x3   :  { %s30_s22 = sshll.u32 %s264_s21, 4  ;;  %s265_s26 = smov 128   ;;  %s31_s22 = int_to_ptr.vmem [resolvable:$true] %s30_s22 }
   0x4   :  { %s266_s27 = smov 8   ;;  %s267_s28 = smov [#allocation2]  }
   0x5   :  { %36 = dma.hbm_to_vmem [thread:$0]  %s29_s20, 512, %s31_s22, [#allocation5], %s265_s26, %s265_s26, %s266_s27  }
   0x6   :  { %s20_s29 = sshll.u32 %s267_s28, 4  ;;  %s42_s7 = sshll.u32 %s320_s2, 4  ;;  %s21_s29 = int_to_ptr.vmem [resolvable:$true] %s20_s29  ;;  %s43_s7 = int_to_ptr.hbm [resolvable:$true] %s42_s7 }
   0x7   :  { %23 = dma.hbm_to_vmem [thread:$0]  %s19_s25, 128, %s21_s29, [#allocation3]  }
   0x8   :  { %s52_s9 = sshll.u32 %s321_s3, 4  ;;  %s268_s10 = smov [#allocation6]   ;;  %s53_s9 = int_to_ptr.hbm [resolvable:$true] %s52_s9 }
   0x9   :  { %s44_s11 = sshll.u32 %s268_s10, 4  ;;  %s269_s0 = smov [#allocation7]   ;;  %s45_s11 = int_to_ptr.vmem [resolvable:$true] %s44_s11 }
   0xa   :  { %47 = dma.hbm_to_vmem [thread:$0]  %s43_s7, 16, %s45_s11, [#allocation5]  }
   0xb   :  { %s54_s12 = sshll.u32 %s269_s0, 4  ;;  %s55_s12 = int_to_ptr.vmem [resolvable:$true] %s54_s12 }
   0xc   :  { %60 = dma.hbm_to_vmem [thread:$0]  %s53_s9, 512, %s55_s12, [#allocation8], %s265_s26, %s265_s26, %s266_s27  }
   0xd   :  { %258 = dma.done.wait [#allocation3], 128  }
   0xe   :  { %259 = vsyncadd [#allocation3], 4294967168 }
   0xf   :  { %260 = dma.done.wait [#allocation5], 528  }
  0x10   :  { %261 = vsyncadd [#allocation5], 4294966768 }
  0x11   :  { %262 = dma.done.wait [#allocation8], 512  }
  0x12   :  { %263 = vsyncadd [#allocation8], 4294966784  ;;  %v83_v0 = vld [vmem:[#allocation4 + $0x18] sm:$0xff]  ;;  %v82_v1 = vld [vmem:[#allocation4 + $0x10] sm:$0xff]  ;;  %vm88_vm0 = vcmask 261120  }
  0x13   :  { %104 = vmatpush.msra.mxu0 %v83_v0  ;;  %v116_v2 = vld [vmem:[#allocation7 + $0x18] sm:$0xff]  ;;  %v81_v3 = vld [vmem:[#allocation4 + $0x8] sm:$0xff]  ;;  %v115_v6 = vld [vmem:[#allocation7 + $0x10] sm:$0xff] }
  0x14   :  { %136 = vmatpush.msra.mxu1 %v116_v2  ;;  %v80_v4 = vld [vmem:[#allocation4] sm:$0xff]  ;;  %v79_v5 = vld [vmem:[#allocation2] sm:$0xff]  ;;  %v114_v7 = vld [vmem:[#allocation7 + $0x8] sm:$0xff] }
  0x15   :  { %105 = vmatpush.msra.mxu0 %v82_v1  ;;  %v113_v8 = vld [vmem:[#allocation7] sm:$0xff]  ;;  %v160_v9 = vld [vmem:[#allocation6] ss:$0 sm:$0xff]  ;;  %v161_v13 = vld [vmem:[%s322_s4] ss:$0 sm:$0xff] }
  0x16   :  { %137 = vmatpush.msra.mxu1 %v115_v6 }
  0x17   :  { %106 = vmatpush.msra.mxu0 %v81_v3 }
  0x18   :  { %138 = vmatpush.msra.mxu1 %v114_v7 }
  0x19   :  { %107 = vmatpush.msra.mxu0 %v80_v4 }
  0x1a   :  { %152 = vmatmul.msk.f32.vlgmr.msra.gmra.mxu0 %vm88_vm0, %v79_v5  ;;  %139 = vmatpush.msra.mxu1 %v113_v8 }
  0x97   :  { %v109_v10 = vpop.f32.mrf.mxu0 }
  0x98   :  { %v110_v11 = vadd.f32 %v160_v9, %v109_v10 }
  0x9a   :  { %v112_v12 = vmax.f32 %v110_v11, 0.0 }
  0x9c   :  { %153 = vmatmul.msk.f32.vlgmr.msra.gmra.mxu1 %vm88_vm0, %v112_v12 }
 0x119   :  { %v141_v14 = vpop.f32.mrf.mxu1 }
 0x11a   :  { %v142_v15 = vadd.f32 %v161_v13, %v141_v14 }
 0x11c   :  { %144 = vst [vmem:[%s323_s5] sm:$0xff] %v142_v15 }
 0x11d   :  { %149 = vsyncpa [#allocation3], 1 }
 0x11e   :  { %150 = vsyncpa [#allocation5], 1 }
 0x11f   :  { %151 = vsyncpa [#allocation8], 1 }

</bundles_post_ra>
